<compile_context>
chip_gen: v7x
topology: tpu7x:2x2x1
jax: 0.10.0
libtpu: 0.0.40
codegen_flags: <defaults>
</compile_context>

<pallas_src>
import math

import jax
import jax.numpy as jnp
from jax.experimental import pallas as pl
from jax.experimental.pallas import tpu as pltpu


def _round_up(x, m):
    return (x + m - 1) // m * m


def shallow_lib_kernel(x_ref, w1_ref, b1_ref, w2_ref, b2_ref, w3_ref, b3_ref,
                       o_ref, h1_ref):
    """One batch tile: out = ((x W1 + b1) W2 + b2) . w3 + b3.

    x_ref:  (TM, Dp)   compute dtype
    w1_ref: (Dp, Hp)   compute dtype     b1_ref: (1, Hp) f32
    w2_ref: (Hp, Dp)   compute dtype     b2_ref: (1, Dp) f32
    w3_ref: (1, Dp)    f32 (fc3 weight as a row)   b3_ref: (1, 1) f32
    o_ref:  (TM, 1)    f32
    h1_ref: (TM, Hp)   compute dtype VMEM scratch
    """
    # fc1 on the MXU, f32 accumulation, staged through VMEM scratch.
    h1 = jnp.dot(x_ref[...], w1_ref[...],
                 preferred_element_type=jnp.float32) + b1_ref[...]
    h1_ref[...] = h1.astype(h1_ref.dtype)

    # fc2 on the MXU, f32 accumulation.
    h2 = jnp.dot(h1_ref[...], w2_ref[...],
                 preferred_element_type=jnp.float32) + b2_ref[...]

    # fc3: (Dp -> 1) done as VPU multiply + lane reduction instead of a
    # 1-output-lane MXU matmul.
    o_ref[...] = (jnp.sum(h2 * w3_ref[...], axis=-1, keepdims=True)
                  + b3_ref[...]).astype(o_ref.dtype)


def shallow_lib_forward(x, params, *, compute_dtype=jnp.float32, tm=None):
    """x: (batch, in_dim) float32. params: PyTorch-convention weights
    (w: (out, in), b: (out,)). Returns (batch, 1) float32."""
    B, D = x.shape
    H = 2 * D
    Dp = _round_up(D, 128)
    Hp = _round_up(H, 128)

    if tm is None:
        tm = min(512, _round_up(B, 8))
    tm = _round_up(tm, 8)
    Bp = _round_up(B, tm)

    w1, b1 = params["w1"], params["b1"]   # (H, D), (H,)
    w2, b2 = params["w2"], params["b2"]   # (D, H), (D,)
    w3, b3 = params["w3"], params["b3"]   # (1, D), (1,)

    f32 = jnp.float32
    # Pre-transpose to (in, out) for lane-dense x @ W; zero-pad feature dims
    # to multiples of 128; downcast MXU operands to compute_dtype.
    w1t = jnp.zeros((Dp, Hp), f32).at[:D, :H].set(w1.T.astype(f32)).astype(compute_dtype)
    w2t = jnp.zeros((Hp, Dp), f32).at[:H, :D].set(w2.T.astype(f32)).astype(compute_dtype)
    w3r = jnp.zeros((1, Dp), f32).at[:, :D].set(w3.reshape(1, D).astype(f32))
    b1r = jnp.zeros((1, Hp), f32).at[:, :H].set(b1.reshape(1, H).astype(f32))
    b2r = jnp.zeros((1, Dp), f32).at[:, :D].set(b2.reshape(1, D).astype(f32))
    b3r = b3.reshape(1, 1).astype(f32)

    xp = jnp.zeros((Bp, Dp), f32).at[:B, :D].set(x.astype(f32)).astype(compute_dtype)

    cd_bytes = jnp.dtype(compute_dtype).itemsize
    est = (2 * tm * Dp * cd_bytes                 # double-buffered x tiles
           + 2 * tm * 1 * 4                       # double-buffered out tiles
           + 2 * (Dp * Hp + Hp * Dp) * cd_bytes   # W1 / W2 (assume 2x buffering)
           + 2 * (Hp + 2 * Dp + 1) * 4            # biases + fc3 row
           + tm * Hp * cd_bytes)                  # h1 scratch
    vmem_limit = int(min(64 << 20, max(16 << 20, 2 * est)))

    grid = (Bp // tm,)
    out = pl.pallas_call(
        shallow_lib_kernel,
        out_shape=jax.ShapeDtypeStruct((Bp, 1), jnp.float32),
        grid_spec=pltpu.PrefetchScalarGridSpec(
            num_scalar_prefetch=0,
            grid=grid,
            in_specs=[
                pl.BlockSpec((tm, Dp), lambda i: (i, 0)),   # x tile
                pl.BlockSpec((Dp, Hp), lambda i: (0, 0)),   # W1 (resident)
                pl.BlockSpec((1, Hp), lambda i: (0, 0)),    # b1
                pl.BlockSpec((Hp, Dp), lambda i: (0, 0)),   # W2 (resident)
                pl.BlockSpec((1, Dp), lambda i: (0, 0)),    # b2
                pl.BlockSpec((1, Dp), lambda i: (0, 0)),    # w3 row
                pl.BlockSpec((1, 1), lambda i: (0, 0)),     # b3
            ],
            out_specs=pl.BlockSpec((tm, 1), lambda i: (i, 0)),
            scratch_shapes=[pltpu.VMEM((tm, Hp), compute_dtype)],
        ),
        compiler_params=pltpu.CompilerParams(
            dimension_semantics=("parallel",),
            vmem_limit_bytes=vmem_limit,
        ),
    )(xp, w1t, b1r, w2t, b2r, w3r, b3r)
    return out[:B]


def init_params(key, in_dim):
    """Deterministic init mimicking nn.Linear default (uniform +-1/sqrt(fan_in))."""
    ks = jax.random.split(key, 6)

    def linear(kw, kb, fan_in, fan_out):
        bound = 1.0 / math.sqrt(float(fan_in))
        w = jax.random.uniform(kw, (fan_out, fan_in), jnp.float32, -bound, bound)
        b = jax.random.uniform(kb, (fan_out,), jnp.float32, -bound, bound)
        return w, b

    w1, b1 = linear(ks[0], ks[1], in_dim, 2 * in_dim)
    w2, b2 = linear(ks[2], ks[3], 2 * in_dim, in_dim)
    w3, b3 = linear(ks[4], ks[5], in_dim, 1)
    return {"w1": w1, "b1": b1, "w2": w2, "b2": b2, "w3": w3, "b3": b3}


if __name__ == "__main__":
    in_dim = 32
    batch = 8

    key = jax.random.PRNGKey(0)
    k_x, k_p = jax.random.split(key)
    x = jax.random.normal(k_x, (batch, in_dim), dtype=jnp.float32)
    params = init_params(k_p, in_dim)

    # Pure-JAX reference.
    h1 = x @ params["w1"].T + params["b1"]
    h2 = h1 @ params["w2"].T + params["b2"]
    ref = h2 @ params["w3"].T + params["b3"]

    # f32 compute path — matches the PyTorch module numerically.
    out_f32 = jax.block_until_ready(
        shallow_lib_forward(x, params, compute_dtype=jnp.float32))
    assert out_f32.shape == (batch, 1)
    assert jnp.allclose(out_f32, ref, atol=1e-4, rtol=1e-4)

    # bf16 MXU-operand path (f32 accumulation) — for v6e/v7x throughput.
    out_bf16 = jax.block_until_ready(
        shallow_lib_forward(x, params, compute_dtype=jnp.bfloat16))
    assert out_bf16.shape == (batch, 1)
    assert jnp.allclose(out_bf16, ref, atol=5e-2, rtol=5e-2)

    print("KERNEL_OK")
</pallas_src>

<mosaic_0001>
module attributes {stable_mosaic.version = 11 : i64} {
  func.func @shallow_lib_kernel(%arg0: i32, %arg1: memref<8x128xf32, #tpu.memory_space<vmem>>, %arg2: memref<128x128xf32, #tpu.memory_space<vmem>>, %arg3: memref<1x128xf32, #tpu.memory_space<vmem>>, %arg4: memref<128x128xf32, #tpu.memory_space<vmem>>, %arg5: memref<1x128xf32, #tpu.memory_space<vmem>>, %arg6: memref<1x128xf32, #tpu.memory_space<vmem>>, %arg7: memref<1x1xf32, #tpu.memory_space<vmem>>, %arg8: memref<8x1xf32, #tpu.memory_space<vmem>>, %arg9: memref<8x128xf32, #tpu.memory_space<vmem>>) attributes {dimension_semantics = [#tpu.dimension_semantics<parallel>], iteration_bounds = array<i64: 1>, scalar_prefetch = 0 : i64, scratch_operands = 1 : i64, tpu.core_type = #tpu.core_type<tc>, window_params = [{transform_indices = @transform_0, window_bounds = array<i64: 8, 128>}, {pipeline_mode = #tpu.pipeline_mode<synchronous>, transform_indices = @transform_1, window_bounds = array<i64: 128, 128>}, {pipeline_mode = #tpu.pipeline_mode<synchronous>, transform_indices = @transform_2, window_bounds = array<i64: 1, 128>}, {pipeline_mode = #tpu.pipeline_mode<synchronous>, transform_indices = @transform_3, window_bounds = array<i64: 128, 128>}, {pipeline_mode = #tpu.pipeline_mode<synchronous>, transform_indices = @transform_4, window_bounds = array<i64: 1, 128>}, {pipeline_mode = #tpu.pipeline_mode<synchronous>, transform_indices = @transform_5, window_bounds = array<i64: 1, 128>}, {pipeline_mode = #tpu.pipeline_mode<synchronous>, transform_indices = @transform_6, window_bounds = array<i64: 1, 1>}, {transform_indices = @transform_7, window_bounds = array<i64: 8, 1>}]} {
    %c0 = arith.constant 0 : index
    %c0_0 = arith.constant 0 : index
    %0 = vector.load %arg1[%c0, %c0_0] : memref<8x128xf32, #tpu.memory_space<vmem>>, vector<8x128xf32>
    %c0_1 = arith.constant 0 : index
    %c0_2 = arith.constant 0 : index
    %1 = vector.load %arg2[%c0_1, %c0_2] : memref<128x128xf32, #tpu.memory_space<vmem>>, vector<128x128xf32>
    %cst = arith.constant dense<0.000000e+00> : vector<8x128xf32>
    %2 = tpu.matmul %0, %1, %cst {dimension_numbers = #tpu.dot_dimension_numbers<[1], [0], [0], [1], [0, 0, 1, 1], [], []>} : vector<8x128xf32>, vector<128x128xf32>, vector<8x128xf32> -> vector<8x128xf32>
    %c0_3 = arith.constant 0 : index
    %c0_4 = arith.constant 0 : index
    %3 = vector.load %arg3[%c0_3, %c0_4] : memref<1x128xf32, #tpu.memory_space<vmem>>, vector<1x128xf32>
    %4 = vector.broadcast %3 : vector<1x128xf32> to vector<8x128xf32>
    %5 = arith.addf %2, %4 : vector<8x128xf32>
    %c0_5 = arith.constant 0 : index
    %c0_6 = arith.constant 0 : index
    %6 = vector.load %arg9[%c0_5, %c0_6] : memref<8x128xf32, #tpu.memory_space<vmem>>, vector<8x128xf32>
    tpu.vector_store %arg9[%c0_5, %c0_6], %5 {strides = array<i32>} : memref<8x128xf32, #tpu.memory_space<vmem>>, vector<8x128xf32>,
    %c0_7 = arith.constant 0 : index
    %c0_8 = arith.constant 0 : index
    %7 = vector.load %arg9[%c0_7, %c0_8] : memref<8x128xf32, #tpu.memory_space<vmem>>, vector<8x128xf32>
    %c0_9 = arith.constant 0 : index
    %c0_10 = arith.constant 0 : index
    %8 = vector.load %arg4[%c0_9, %c0_10] : memref<128x128xf32, #tpu.memory_space<vmem>>, vector<128x128xf32>
    %cst_11 = arith.constant dense<0.000000e+00> : vector<8x128xf32>
    %9 = tpu.matmul %7, %8, %cst_11 {dimension_numbers = #tpu.dot_dimension_numbers<[1], [0], [0], [1], [0, 0, 1, 1], [], []>} : vector<8x128xf32>, vector<128x128xf32>, vector<8x128xf32> -> vector<8x128xf32>
    %c0_12 = arith.constant 0 : index
    %c0_13 = arith.constant 0 : index
    %10 = vector.load %arg5[%c0_12, %c0_13] : memref<1x128xf32, #tpu.memory_space<vmem>>, vector<1x128xf32>
    %11 = vector.broadcast %10 : vector<1x128xf32> to vector<8x128xf32>
    %12 = arith.addf %9, %11 : vector<8x128xf32>
    %c0_14 = arith.constant 0 : index
    %c0_15 = arith.constant 0 : index
    %13 = vector.load %arg6[%c0_14, %c0_15] : memref<1x128xf32, #tpu.memory_space<vmem>>, vector<1x128xf32>
    %14 = vector.broadcast %13 : vector<1x128xf32> to vector<8x128xf32>
    %15 = arith.mulf %12, %14 : vector<8x128xf32>
    %cst_16 = arith.constant dense<0.000000e+00> : vector<8xf32>
    %16 = vector.multi_reduction <add>, %15, %cst_16 [1] : vector<8x128xf32> to vector<8xf32>
    %17 = vector.shape_cast %16 : vector<8xf32> to vector<8x1xf32>
    %c0_17 = arith.constant 0 : index
    %c0_18 = arith.constant 0 : index
    %18 = vector.load %arg7[%c0_17, %c0_18] : memref<1x1xf32, #tpu.memory_space<vmem>>, vector<1x1xf32>
    %19 = vector.broadcast %18 : vector<1x1xf32> to vector<8x1xf32>
    %20 = arith.addf %17, %19 : vector<8x1xf32>
    %c0_19 = arith.constant 0 : index
    %c0_20 = arith.constant 0 : index
    %21 = vector.load %arg8[%c0_19, %c0_20] : memref<8x1xf32, #tpu.memory_space<vmem>>, vector<8x1xf32>
    tpu.vector_store %arg8[%c0_19, %c0_20], %20 {strides = array<i32>} : memref<8x1xf32, #tpu.memory_space<vmem>>, vector<8x1xf32>,
    return
  }
  func.func @transform_0(%arg0: i32) -> (i32, i32) {
    %c0_i32 = arith.constant 0 : i32
    %c0_i32_0 = arith.constant 0 : i32
    return %arg0, %c0_i32 : i32, i32
  }
  func.func @transform_1(%arg0: i32) -> (i32, i32) {
    %c0_i32 = arith.constant 0 : i32
    %c0_i32_0 = arith.constant 0 : i32
    %c0_i32_1 = arith.constant 0 : i32
    return %c0_i32, %c0_i32_0 : i32, i32
  }
  func.func @transform_2(%arg0: i32) -> (i32, i32) {
    %c0_i32 = arith.constant 0 : i32
    %c0_i32_0 = arith.constant 0 : i32
    %c0_i32_1 = arith.constant 0 : i32
    return %c0_i32, %c0_i32_0 : i32, i32
  }
  func.func @transform_3(%arg0: i32) -> (i32, i32) {
    %c0_i32 = arith.constant 0 : i32
    %c0_i32_0 = arith.constant 0 : i32
    %c0_i32_1 = arith.constant 0 : i32
    return %c0_i32, %c0_i32_0 : i32, i32
  }
  func.func @transform_4(%arg0: i32) -> (i32, i32) {
    %c0_i32 = arith.constant 0 : i32
    %c0_i32_0 = arith.constant 0 : i32
    %c0_i32_1 = arith.constant 0 : i32
    return %c0_i32, %c0_i32_0 : i32, i32
  }
  func.func @transform_5(%arg0: i32) -> (i32, i32) {
    %c0_i32 = arith.constant 0 : i32
    %c0_i32_0 = arith.constant 0 : i32
    %c0_i32_1 = arith.constant 0 : i32
    return %c0_i32, %c0_i32_0 : i32, i32
  }
  func.func @transform_6(%arg0: i32) -> (i32, i32) {
    %c0_i32 = arith.constant 0 : i32
    %c0_i32_0 = arith.constant 0 : i32
    %c0_i32_1 = arith.constant 0 : i32
    return %c0_i32, %c0_i32_0 : i32, i32
  }
  func.func @transform_7(%arg0: i32) -> (i32, i32) {
    %c0_i32 = arith.constant 0 : i32
    %c0_i32_0 = arith.constant 0 : i32
    return %arg0, %c0_i32 : i32, i32
  }
}

</mosaic_0001>

<bundles_post_ra>
// kernel: tpu_custom_call.1
= control target key start
LH: loop header
LB: loop body
LE: loop exit
PB: predicated region body
PF: predicated region fallthrough
CT: control target
= control target key end

     0   :  { %s637_s0 = inlined_call_operand.hbm [shape: f32[8,128], index: 0, kind: input, shape index: {}]   ;;  %s638_s1 = inlined_call_operand.hbm [shape: f32[128,128], index: 1, kind: input, shape index: {}]   ;;  %s639_s2 = inlined_call_operand.vmem [shape: f32[1,128], index: 2, kind: input, shape index: {}]   ;;  %s640_s3 = inlined_call_operand.hbm [shape: f32[128,128], index: 3, kind: input, shape index: {}]   ;;  %s641_s4 = inlined_call_operand.vmem [shape: f32[1,128], index: 4, kind: input, shape index: {}]   ;;  %s642_s5 = inlined_call_operand.vmem [shape: f32[1,128], index: 5, kind: input, shape index: {}]   ;;  %s643_s6 = inlined_call_operand.<no memory space> [shape: f32[1,1], index: 6, kind: input, shape index: {}]   ;;  %s644_s7 = inlined_call_operand.vmem [shape: f32[8,1], index: 7, kind: output, shape index: {}]  }
   0x1   :  { %v12_v0 = vstv %s643_s6 }
   0x2   :  { %13 = vst [vmem:[#allocation3] sm:$0x1] %v12_v0 }
   0x3   :  { %14 = vsyncpa [#allocation5], 0 }
   0x4   :  { %15 = vsyncpa [#allocation7], 0  ;;  %s516_s26 = smov [#allocation6]   ;;  %s446_s30 = scalar_lea.hbm %s638_s1, 2048 }
   0x5   :  { %s31_s27 = sshll.u32 %s516_s26, 4  ;;  %p447_p0 = scmp.ne.s32.totalorder %s638_s1, %s446_s30  ;;  %s32_s27 = int_to_ptr.vmem [resolvable:$true] %s31_s27 }
   0x6   :  { %p450_p1 = scmp.lt.u32.totalorder %s446_s30, %s638_s1 }
   0x8   :  { %p452_p2 = pnand %p450_p1, %p447_p0 }
   0xa   :  { %455 = shalt.err (!%p452_p2)
}
   0xb   :  { %s456_s6 = scalar_lea.vmem %s32_s27, 2048  ;;  %p461_p4 = scmp.lt.s32.totalorder %s32_s27, %s32_s27 }
   0xc   :  { %p457_p3 = scmp.ne.s32.totalorder %s32_s27, %s456_s6  ;;  %p462_p5 = scmp.lt.s32.totalorder %s456_s6, %s456_s6 }
   0xe   :  { %p463_p6 = por %p462_p5, %p461_p4 }
  0x10   :  { %p464_p7 = pnand %p463_p6, %p457_p3 }
  0x12   :  { %467 = shalt.err (!%p464_p7)
}
  0x13   :  { %s517_s12 = smov 128   ;;  %s518_s13 = smov 8  }
  0x14   :  { %37 = dma.hbm_to_vmem [thread:$0]  %s638_s1, 2048, %s32_s27, [#allocation7], %s517_s12, %s517_s12, %s518_s13  }
  0x15   :  { %s519_s16 = smov [#allocation4]   ;;  %s520_s18 = smov [#allocation8]  }
  0x16   :  { %s22_s17 = sshll.u32 %s519_s16, 4  ;;  %s45_s19 = sshll.u32 %s520_s18, 4  ;;  %s23_s17 = int_to_ptr.vmem [resolvable:$true] %s22_s17  ;;  %s46_s19 = int_to_ptr.vmem [resolvable:$true] %s45_s19 }
  0x17   :  { %s468_s22 = scalar_lea.hbm %s637_s0, 128 }
  0x18   :  { %p469_p8 = scmp.ne.s32.totalorder %s637_s0, %s468_s22  ;;  %p472_p9 = scmp.lt.u32.totalorder %s468_s22, %s637_s0 }
  0x1a   :  { %p474_p10 = pnand %p472_p9, %p469_p8 }
  0x1c   :  { %477 = shalt.err (!%p474_p10)
}
  0x1d   :  { %s478_s1 = scalar_lea.vmem %s23_s17, 128  ;;  %p483_p12 = scmp.lt.s32.totalorder %s23_s17, %s23_s17 }
  0x1e   :  { %p479_p11 = scmp.ne.s32.totalorder %s23_s17, %s478_s1  ;;  %p484_p13 = scmp.lt.s32.totalorder %s478_s1, %s478_s1 }
  0x20   :  { %p485_p0 = por %p484_p13, %p483_p12 }
  0x22   :  { %p486_p1 = pnand %p485_p0, %p479_p11 }
  0x24   :  { %489 = shalt.err (!%p486_p1)
}
  0x25   :  { %25 = dma.hbm_to_vmem [thread:$0]  %s637_s0, 128, %s23_s17, [#allocation5]  }
  0x26   :  { %s490_s8 = scalar_lea.hbm %s640_s3, 2048 }
  0x27   :  { %p491_p2 = scmp.ne.s32.totalorder %s640_s3, %s490_s8  ;;  %p494_p3 = scmp.lt.u32.totalorder %s490_s8, %s640_s3 }
  0x29   :  { %p496_p4 = pnand %p494_p3, %p491_p2 }
  0x2b   :  { %499 = shalt.err (!%p496_p4)
}
  0x2c   :  { %s500_s14 = scalar_lea.vmem %s46_s19, 2048  ;;  %p505_p6 = scmp.lt.s32.totalorder %s46_s19, %s46_s19 }
  0x2d   :  { %p501_p5 = scmp.ne.s32.totalorder %s46_s19, %s500_s14  ;;  %p506_p7 = scmp.lt.s32.totalorder %s500_s14, %s500_s14 }
  0x2f   :  { %p507_p8 = por %p506_p7, %p505_p6 }
  0x31   :  { %p508_p9 = pnand %p507_p8, %p501_p5 }
  0x33   :  { %511 = shalt.err (!%p508_p9)
}
  0x34   :  { %51 = dma.hbm_to_vmem [thread:$0]  %s640_s3, 2048, %s46_s19, [#allocation7], %s517_s12, %s517_s12, %s518_s13  }
  0x35   :  { %512 = dma.done.wait [#allocation5], 128  }
  0x36   :  { %513 = vsyncadd [#allocation5], 4294967168 }
  0x37   :  { %514 = dma.done.wait [#allocation7], 4096  }
  0x38   :  { %515 = vsyncadd [#allocation7], 4294963200  ;;  %v521_v1 = vmov 0.0|0.0   ;;  %vm522_vm0 = vmmov 0   ;;  %v523_v2 = vmov 0.0   ;;  %v68_v3 = vld [vmem:[#allocation6] sm:$0xff] }
  0x39   :  { %390 = vmatprep.subr.bf16.mxu0 %v521_v1  ;;  %352 = vmatprep.mubr.msk.f32.mxu0 %vm522_vm0, %v523_v2  ;;  %v69_v4 = vld [vmem:[#allocation6 + $0x8] sm:$0xff]  ;;  %v70_v5 = vld [vmem:[#allocation6 + $0x10] sm:$0xff]  ;;  %v71_v7 = vld [vmem:[#allocation6 + $0x18] sm:$0xff]  ;;  %vm274_vm1 = vcmask 7168  }
  0x3a   :  { %414 = vmatprep.subr.bf16.mxu1 %v521_v1  ;;  %387 = vmatprep.mubr.msk.f32.mxu1 %vm522_vm0, %v523_v2  ;;  %v391_v6 = vpack.c.bf16 %v69_v4, %v68_v3  ;;  %v394_v8 = vpack.c.bf16 %v71_v7, %v70_v5  ;;  %v72_v9 = vld [vmem:[#allocation6 + $0x20] sm:$0xff]  ;;  %v73_v10 = vld [vmem:[#allocation6 + $0x28] sm:$0xff]  ;;  %v165_v13 = vld [vmem:[#allocation8 + $0x10] sm:$0xff] }
  0x3b   :  { %v163_v11 = vld [vmem:[#allocation8] sm:$0xff]  ;;  %v164_v12 = vld [vmem:[#allocation8 + $0x8] sm:$0xff]  ;;  %v166_v14 = vld [vmem:[#allocation8 + $0x18] sm:$0xff]  ;;  %v397_v15 = vpack.c.bf16 %v73_v10, %v72_v9 }
  0x3c   :  { %392 = vmatpush3.bf16.msra.mxu0 %v391_v6  ;;  %v415_v16 = vpack.c.bf16 %v164_v12, %v163_v11  ;;  %v74_v17 = vld [vmem:[#allocation6 + $0x30] sm:$0xff]  ;;  %v75_v18 = vld [vmem:[#allocation6 + $0x38] sm:$0xff]  ;;  %v418_v19 = vpack.c.bf16 %v166_v14, %v165_v13  ;;  %v167_v20 = vld [vmem:[#allocation8 + $0x20] sm:$0xff] }
  0x3d   :  { %393 = vmatprep.subr.bf16.mxu0 %v521_v1  ;;  %v168_v21 = vld [vmem:[#allocation8 + $0x28] sm:$0xff]  ;;  %v400_v22 = vpack.c.bf16 %v75_v18, %v74_v17  ;;  %v76_v23 = vld [vmem:[#allocation6 + $0x40] sm:$0xff]  ;;  %v169_v26 = vld [vmem:[#allocation8 + $0x30] sm:$0xff] }
  0x3e   :  { %416 = vmatpush3.bf16.msra.mxu1 %v415_v16  ;;  %v77_v24 = vld [vmem:[#allocation6 + $0x48] sm:$0xff]  ;;  %v421_v25 = vpack.c.bf16 %v168_v21, %v167_v20  ;;  %v170_v27 = vld [vmem:[#allocation8 + $0x38] sm:$0xff]  ;;  %v78_v29 = vld [vmem:[#allocation6 + $0x50] sm:$0xff] }
  0x3f   :  { %417 = vmatprep.subr.bf16.mxu1 %v521_v1  ;;  %v403_v28 = vpack.c.bf16 %v77_v24, %v76_v23  ;;  %v79_v30 = vld [vmem:[#allocation6 + $0x58] sm:$0xff]  ;;  %v424_v31 = vpack.c.bf16 %v170_v27, %v169_v26  ;;  %v171_v32 = vld [vmem:[#allocation8 + $0x40] sm:$0xff]  ;;  %v172_v33 = vld [vmem:[#allocation8 + $0x48] sm:$0xff] }
  0x40   :  { %395 = vmatpush3.bf16.msra.mxu0 %v394_v8  ;;  %v406_v34 = vpack.c.bf16 %v79_v30, %v78_v29  ;;  %v80_v35 = vld [vmem:[#allocation6 + $0x60] sm:$0xff]  ;;  %v81_v36 = vld [vmem:[#allocation6 + $0x68] sm:$0xff]  ;;  %v427_v37 = vpack.c.bf16 %v172_v33, %v171_v32  ;;  %v173_v38 = vld [vmem:[#allocation8 + $0x50] sm:$0xff] }
  0x41   :  { %396 = vmatprep.subr.bf16.mxu0 %v521_v1  ;;  %v174_v39 = vld [vmem:[#allocation8 + $0x58] sm:$0xff]  ;;  %v409_v40 = vpack.c.bf16 %v81_v36, %v80_v35  ;;  %v82_v41 = vld [vmem:[#allocation6 + $0x70] sm:$0xff]  ;;  %v175_v44 = vld [vmem:[#allocation8 + $0x60] sm:$0xff] }
  0x42   :  { %419 = vmatpush3.bf16.msra.mxu1 %v418_v19  ;;  %v83_v42 = vld [vmem:[#allocation6 + $0x78] sm:$0xff]  ;;  %v430_v43 = vpack.c.bf16 %v174_v39, %v173_v38  ;;  %v176_v45 = vld [vmem:[#allocation8 + $0x68] sm:$0xff]  ;;  %v177_v49 = vld [vmem:[#allocation8 + $0x70] sm:$0xff] }
  0x43   :  { %420 = vmatprep.subr.bf16.mxu1 %v521_v1  ;;  %v412_v46 = vpack.c.bf16 %v83_v42, %v82_v41  ;;  %v433_v47 = vpack.c.bf16 %v176_v45, %v175_v44  ;;  %v67_v48 = vld [vmem:[#allocation4] sm:$0xff]  ;;  %v282_v52 = vld [vmem:[%s639_s2] ss:$0 sm:$0xff] }
  0x44   :  { %398 = vmatpush3.bf16.msra.mxu0 %v397_v15  ;;  %v178_v50 = vld [vmem:[#allocation8 + $0x78] sm:$0xff]  ;;  %v283_v56 = vld [vmem:[%s641_s4] ss:$0 sm:$0xff] }
  0x45   :  { %399 = vmatprep.subr.bf16.mxu0 %v521_v1  ;;  %v436_v51 = vpack.c.bf16 %v178_v50, %v177_v49  ;;  %v284_v58 = vld [vmem:[%s642_s5] ss:$0 sm:$0xff] }
  0x46   :  { %422 = vmatpush3.bf16.msra.mxu1 %v421_v25  ;;  %v285_v62 = vld [vmem:[#allocation3] ss:$0 sm:$0xff] }
  0x47   :  { %423 = vmatprep.subr.bf16.mxu1 %v521_v1 }
  0x48   :  { %401 = vmatpush3.bf16.msra.mxu0 %v400_v22 }
  0x49   :  { %402 = vmatprep.subr.bf16.mxu0 %v521_v1 }
  0x4a   :  { %425 = vmatpush3.bf16.msra.mxu1 %v424_v31 }
  0x4b   :  { %426 = vmatprep.subr.bf16.mxu1 %v521_v1 }
  0x4c   :  { %404 = vmatpush3.bf16.msra.mxu0 %v403_v28 }
  0x4d   :  { %405 = vmatprep.subr.bf16.mxu0 %v521_v1 }
  0x4e   :  { %428 = vmatpush3.bf16.msra.mxu1 %v427_v37 }
  0x4f   :  { %429 = vmatprep.subr.bf16.mxu1 %v521_v1 }
  0x50   :  { %407 = vmatpush3.bf16.msra.mxu0 %v406_v34 }
  0x51   :  { %408 = vmatprep.subr.bf16.mxu0 %v521_v1 }
  0x52   :  { %431 = vmatpush3.bf16.msra.mxu1 %v430_v43 }
  0x53   :  { %432 = vmatprep.subr.bf16.mxu1 %v521_v1 }
  0x54   :  { %410 = vmatpush3.bf16.msra.mxu0 %v409_v40 }
  0x55   :  { %411 = vmatprep.subr.bf16.mxu0 %v521_v1 }
  0x56   :  { %434 = vmatpush3.bf16.msra.mxu1 %v433_v47 }
  0x57   :  { %435 = vmatprep.subr.bf16.mxu1 %v521_v1 }
  0x58   :  { %413 = vmatpush3.bf16.msra.mxu0 %v412_v46 }
  0x5a   :  { %437 = vmatpush3.bf16.msra.mxu1 %v436_v51 }
  0x5b   :  { %353 = vmatmul.mubr.f32.vlgmr.msra.gmra.mrb[0].mxu0 %v67_v48 }
 0x12e   :  { %v157_v53 = vpop.f32.mrb[0].mxu0 }
 0x12f   :  { %v158_v54 = vadd.f32 %v282_v52, %v157_v53  ;;  %v354_v55 = vpop.f32.mrb[1].mxu0 }
 0x131   :  { %388 = vmatmul.mubr.f32.vlgmr.msra.gmra.mrb[0].mxu1 %v158_v54 }
 0x204   :  { %v252_v57 = vpop.f32.mrb[0].mxu1 }
 0x205   :  { %v253_v59 = vadd.f32 %v283_v56, %v252_v57  ;;  %v389_v60 = vpop.f32.mrb[1].mxu1 }
 0x207   :  { %v263_v61 = vmul.f32 %v284_v58, %v253_v59 }
 0x209   :  { %264 = vadd.xlane.f32.xlu0 %v263_v61 }
 0x296   :  { %v265_v63 = vpop.xlane.xlu0 %264 }
 0x297   :  { %v273_v0 = vadd.f32 %v285_v62, %v265_v63 }
 0x299   :  { %275 = vst.msk [vmem:[%s644_s7] sm:$0xff] %vm274_vm1, %v273_v0 }
 0x29a   :  { %280 = vsyncpa [#allocation5], 1 }
 0x29b   :  { %281 = vsyncpa [#allocation7], 1 }

</bundles_post_ra>
